<compile_context>
chip_gen: v6e
topology: v6e:2x2x1
jax: 0.10.0
libtpu: 0.0.40
codegen_flags: <defaults>
</compile_context>

<pallas_src>
import functools

import jax
import jax.numpy as jnp
from jax.experimental import pallas as pl
from jax.experimental.pallas import tpu as pltpu


# ----------------------------------------------------------------------------
# Packed-parameter layout
# ----------------------------------------------------------------------------

_SUB = 16     # sublane alignment (covers f32 (8,128) and bf16 (16,128) tiling)
_LANE = 128   # lane alignment


def _align(x, m):
    return (x + m - 1) // m * m


def _layout(S, A, H):
    """Row offsets / widths of each section inside the packed weight buffer."""
    W_H = _align(H, _LANE)                 # lane width of hidden activations
    W_MID = _align(3 * H, _LANE)           # lane width of [s1 | a1 | latent]
    OUT_W = _align(S + 1 + A + H, _LANE)   # lane width of the output slab
    width = max(W_H, W_MID, OUT_W)

    r_w1s = 0                              # w1 rows for `states`      [S,  W_H]
    r_w1a = r_w1s + _align(S, _SUB)        # w1 rows for `actions`     [A,  W_H]
    r_w2 = r_w1a + _align(A, _SUB)         # encoder layer 2           [W_H,W_H]
    r_lat = r_w2 + W_H                     # fused [ws1 | wa1 | I_H]   [W_H,W_MID]
    r_dec = r_lat + W_H                    # augmented decoder         [W_MID,OUT_W]
    n_rows = r_dec + W_MID
    return dict(S=S, A=A, H=H, W_H=W_H, W_MID=W_MID, OUT_W=OUT_W, width=width,
                r_w1s=r_w1s, r_w1a=r_w1a, r_w2=r_w2, r_lat=r_lat, r_dec=r_dec,
                n_rows=n_rows)


def pack_params(params, state_dim, action_dim, hidden_dim, dtype=jnp.float32):
    """Pack all AutoEncoder weights into one lane-aligned 2-D buffer.

    bf16 storage is MXU-native on v5e/v6e/v7x (the "no bf16" v5e limitation is
    VPU/EUP-only); activations + accumulation always stay f32 in the kernel.
    """
    S, A, H = state_dim, action_dim, hidden_dim
    lay = _layout(S, A, H)
    r_w1s, r_w1a, r_w2 = lay["r_w1s"], lay["r_w1a"], lay["r_w2"]
    r_lat, r_dec = lay["r_lat"], lay["r_dec"]

    buf = jnp.zeros((lay["n_rows"], lay["width"]), jnp.float32)
    eye = jnp.eye(H, dtype=jnp.float32)

    w1 = params["w1"]                                             # [S+A, H]
    buf = buf.at[r_w1s:r_w1s + S, 0:H].set(w1[:S])                # w1_s
    buf = buf.at[r_w1a:r_w1a + A, 0:H].set(w1[S:])                # w1_a
    buf = buf.at[r_w2:r_w2 + H, 0:H].set(params["w2"])            # encoder l2

    # fused latent consumers + latent passthrough: [ws1 | wa1 | I_H]
    buf = buf.at[r_lat:r_lat + H, 0:H].set(params["ws1"])
    buf = buf.at[r_lat:r_lat + H, H:2 * H].set(params["wa1"])
    buf = buf.at[r_lat:r_lat + H, 2 * H:3 * H].set(eye)

    # augmented decoder: rows [relu(s1) | relu(a1) | latent] -> output slab
    #   cols: [next_state (0:S) | reward (S) | recon_action (S+1:S+1+A)
    #          | latent (S+1+A : S+1+A+H) | zero pad]
    buf = buf.at[r_dec:r_dec + H, 0:S].set(params["ws2"])
    buf = buf.at[r_dec + H:r_dec + 2 * H, S + 1:S + 1 + A].set(params["wa2"])
    buf = buf.at[r_dec + 2 * H:r_dec + 3 * H, S:S + 1].set(params["wr"])
    buf = buf.at[r_dec + 2 * H:r_dec + 3 * H,
                 S + 1 + A:S + 1 + A + H].set(eye)
    return buf.astype(dtype)


def pack_biases(params, state_dim, action_dim, hidden_dim):
    """Biases always stay f32 (tiny buffer), regardless of weight dtype."""
    S, A, H = state_dim, action_dim, hidden_dim
    lay = _layout(S, A, H)
    bias = jnp.zeros((8, lay["width"]), jnp.float32)
    bias = bias.at[0, 0:H].set(params["b1"][0])                   # encoder l1
    bias = bias.at[1, 0:H].set(params["b2"][0])                   # encoder l2
    bias = bias.at[2, 0:H].set(params["bs1"][0])                  # state dec l1
    bias = bias.at[2, H:2 * H].set(params["ba1"][0])              # action dec l1
    # row 2 cols 2H:3H stay 0 (latent passthrough, no bias)
    bias = bias.at[3, 0:S].set(params["bs2"][0])                  # next_state
    # col S stays 0 (reward_emb has no bias)
    bias = bias.at[3, S + 1:S + 1 + A].set(params["ba2"][0])      # recon_action
    # cols S+1+A.. stay 0 (latent passthrough / pad)
    return bias


# ----------------------------------------------------------------------------
# Kernel
# ----------------------------------------------------------------------------

def _make_kernel(lay):
    S, A = lay["S"], lay["A"]
    W_H, W_MID, OUT_W = lay["W_H"], lay["W_MID"], lay["OUT_W"]
    r_w1s, r_w1a, r_w2 = lay["r_w1s"], lay["r_w1a"], lay["r_w2"]
    r_lat, r_dec = lay["r_lat"], lay["r_dec"]

    def kernel(s_ref, a_ref, p_ref, b_ref, out_ref):
        wdt = p_ref.dtype                       # f32 or bf16 weight storage
        states = s_ref[...].astype(wdt)
        actions = a_ref[...].astype(wdt)

        # static, full-lane-width views into the single packed weight block
        w1s = p_ref[r_w1s:r_w1s + S, 0:W_H]
        w1a = p_ref[r_w1a:r_w1a + A, 0:W_H]
        w2 = p_ref[r_w2:r_w2 + W_H, 0:W_H]
        wlat = p_ref[r_lat:r_lat + W_H, 0:W_MID]        # [ws1 | wa1 | I_H]
        wdec = p_ref[r_dec:r_dec + W_MID, 0:OUT_W]      # augmented decoder

        b1 = b_ref[0:1, 0:W_H]
        b2 = b_ref[1:2, 0:W_H]
        blat = b_ref[2:3, 0:W_MID]
        bdec = b_ref[3:4, 0:OUT_W]

        # encoder: relu(states@w1_s + actions@w1_a + b1) -> relu(@w2 + b2)
        h1 = (jnp.dot(states, w1s, preferred_element_type=jnp.float32)
              + jnp.dot(actions, w1a, preferred_element_type=jnp.float32)
              + b1)
        h1 = jnp.maximum(h1, 0.0)
        latent = jnp.dot(h1.astype(wdt), w2,
                         preferred_element_type=jnp.float32) + b2
        latent = jnp.maximum(latent, 0.0)

        # fused [s1 | a1 | latent-passthrough]; the ReLU is a no-op on the
        # latent columns (identity weight, zero bias, latent >= 0).
        h2 = jnp.dot(latent.astype(wdt), wlat,
                     preferred_element_type=jnp.float32) + blat
        h2 = jnp.maximum(h2, 0.0)

        # augmented decoder: result IS the packed, lane-dense output slab
        # [next_state | reward | recon_action | latent | 0-pad]
        out = jnp.dot(h2.astype(wdt), wdec,
                      preferred_element_type=jnp.float32) + bdec
        out_ref[...] = out.astype(out_ref.dtype)

    return kernel


# ----------------------------------------------------------------------------
# Wrapper
# ----------------------------------------------------------------------------

def autoencoder_forward(states, actions, packed_params, bias_params, *,
                        state_dim, action_dim, hidden_dim,
                        block_b=None, out_dtype=jnp.float32,
                        single_buffer_params=False):
    """Returns (next_state, reward, reconstructed_action, latent)."""
    S, A, H = state_dim, action_dim, hidden_dim
    B = states.shape[0]
    lay = _layout(S, A, H)
    n_rows, width, OUT_W = lay["n_rows"], lay["width"], lay["OUT_W"]
    W_H, W_MID = lay["W_H"], lay["W_MID"]

    # ---- batch tiling ------------------------------------------------------
    # Per-grid-step overhead dominates at small blocks, so single-block up to
    # 1024 rows; above that, blocks of <= 2048 rows with >= 2 grid steps so the
    # "parallel" batch axis can shard across v7x's two TensorCores.
    if block_b is None:
        if B <= 1024:
            block_b = B
        else:
            n_blocks = max(2, pl.cdiv(B, 2048))
            block_b = _align(pl.cdiv(B, n_blocks), 8)
    block_b = max(1, min(block_b, B))

    n_blocks = pl.cdiv(B, block_b)
    B_pad = n_blocks * block_b
    if B_pad != B:                       # pad instead of collapsing to 1 block
        states = jnp.pad(states, ((0, B_pad - B), (0, 0)))
        actions = jnp.pad(actions, ((0, B_pad - B), (0, 0)))
    grid = (n_blocks,)

    kernel = _make_kernel(lay)

    # ---- cost / VMEM accounting --------------------------------------------
    p_itemsize = jnp.dtype(packed_params.dtype).itemsize
    out_itemsize = jnp.dtype(out_dtype).itemsize
    flops = 2 * B_pad * ((S + A) * H + H * H + 2 * H * H
                         + H * (S + A + 1) + H)
    bytes_accessed = (B_pad * (S + A) * 4 + B_pad * OUT_W * out_itemsize
                      + n_rows * width * p_itemsize + 8 * width * 4)

    p_bytes = n_rows * width * p_itemsize
    b_bytes = 8 * width * 4
    io_bytes = block_b * ((S + A) * 4 + OUT_W * out_itemsize)
    act_bytes = block_b * (2 * W_H + W_MID + OUT_W) * 4
    vmem_est = 2 * (p_bytes + b_bytes + io_bytes) + act_bytes
    vmem_limit = int(min(64 << 20, max(2 * vmem_est, 32 << 20)))

    # Grid-invariant parameter slab: optionally single-buffer it (no benefit to
    # double-buffering a block whose index_map is constant; matters for large H
    # against v7x's 64 MiB VMEM).  Off by default for maximum compatibility.
    if single_buffer_params:
        param_spec = pl.BlockSpec((n_rows, width), lambda i: (0, 0),
                                  pipeline_mode=pl.Buffered(1))
    else:
        param_spec = pl.BlockSpec((n_rows, width), lambda i: (0, 0))

    out = pl.pallas_call(
        kernel,
        out_shape=jax.ShapeDtypeStruct((B_pad, OUT_W), out_dtype),
        grid=grid,
        in_specs=[
            pl.BlockSpec((block_b, S), lambda i: (i, 0)),
            pl.BlockSpec((block_b, A), lambda i: (i, 0)),
            param_spec,                                      # weights, resident
            pl.BlockSpec((8, width), lambda i: (0, 0)),      # f32 biases
        ],
        out_specs=pl.BlockSpec((block_b, OUT_W), lambda i: (i, 0)),
        compiler_params=pltpu.CompilerParams(
            dimension_semantics=("parallel",),
            vmem_limit_bytes=vmem_limit),
        cost_estimate=pl.CostEstimate(flops=flops, transcendentals=0,
                                      bytes_accessed=int(bytes_accessed)),
    )(states, actions, packed_params, bias_params)

    out = out[:B]
    next_state = out[:, 0:S]
    reward = out[:, S:S + 1]
    recon_action = out[:, S + 1:S + 1 + A]
    latent = out[:, S + 1 + A:S + 1 + A + H]
    return next_state, reward, recon_action, latent


# ----------------------------------------------------------------------------
# Parameter init (mimics nn.Linear U[-1/sqrt(fan_in), 1/sqrt(fan_in)]).
# Weights stored as [in, out] (pre-transposed vs. PyTorch's [out, in]).
# ----------------------------------------------------------------------------

def init_params(key, state_dim, action_dim, hidden_dim):
    def linear(k, fan_in, fan_out, bias=True):
        kw, kb = jax.random.split(k)
        bound = 1.0 / jnp.sqrt(jnp.float32(fan_in))
        w = jax.random.uniform(kw, (fan_in, fan_out), jnp.float32, -bound, bound)
        if not bias:
            return w, None
        b = jax.random.uniform(kb, (1, fan_out), jnp.float32, -bound, bound)
        return w, b

    ks = jax.random.split(key, 7)
    w1, b1 = linear(ks[0], state_dim + action_dim, hidden_dim)
    w2, b2 = linear(ks[1], hidden_dim, hidden_dim)
    wr, _ = linear(ks[2], hidden_dim, 1, bias=False)
    ws1, bs1 = linear(ks[3], hidden_dim, hidden_dim)
    ws2, bs2 = linear(ks[4], hidden_dim, state_dim)
    wa1, ba1 = linear(ks[5], hidden_dim, hidden_dim)
    wa2, ba2 = linear(ks[6], hidden_dim, action_dim)
    return dict(
        w1=w1, b1=b1, w2=w2, b2=b2, wr=wr,
        ws1=ws1, bs1=bs1, ws2=ws2, bs2=bs2,
        wa1=wa1, ba1=ba1, wa2=wa2, ba2=ba2,
    )


if __name__ == "__main__":
    B, STATE_DIM, ACTION_DIM, HIDDEN_DIM = 8, 16, 8, 32

    key = jax.random.PRNGKey(0)
    k_params, k_s, k_a = jax.random.split(key, 3)

    params = init_params(k_params, STATE_DIM, ACTION_DIM, HIDDEN_DIM)
    states = jax.random.normal(k_s, (B, STATE_DIM), jnp.float32)
    actions = jax.random.normal(k_a, (B, ACTION_DIM), jnp.float32)

    bias_f32 = pack_biases(params, STATE_DIM, ACTION_DIM, HIDDEN_DIM)

    # ---- f32 weights, f32 output: exact check vs. plain-JAX reference -------
    fwd_f32 = jax.jit(functools.partial(
        autoencoder_forward, state_dim=STATE_DIM, action_dim=ACTION_DIM,
        hidden_dim=HIDDEN_DIM, out_dtype=jnp.float32))
    packed_f32 = pack_params(params, STATE_DIM, ACTION_DIM, HIDDEN_DIM,
                             dtype=jnp.float32)
    next_state, reward, recon_action, latent = fwd_f32(
        states, actions, packed_f32, bias_f32)
    jax.block_until_ready((next_state, reward, recon_action, latent))

    x = jnp.concatenate([states, actions], axis=-1)
    h1 = jnp.maximum(x @ params["w1"] + params["b1"], 0.0)
    lat_ref = jnp.maximum(h1 @ params["w2"] + params["b2"], 0.0)
    r_ref = lat_ref @ params["wr"]
    ns_ref = (jnp.maximum(lat_ref @ params["ws1"] + params["bs1"], 0.0)
              @ params["ws2"] + params["bs2"])
    ra_ref = (jnp.maximum(lat_ref @ params["wa1"] + params["ba1"], 0.0)
              @ params["wa2"] + params["ba2"])

    assert jnp.allclose(latent, lat_ref, atol=2e-4, rtol=2e-4)
    assert jnp.allclose(reward, r_ref, atol=2e-4, rtol=2e-4)
    assert jnp.allclose(next_state, ns_ref, atol=2e-4, rtol=2e-4)
    assert jnp.allclose(recon_action, ra_ref, atol=2e-4, rtol=2e-4)

    # ---- bf16 weights + bf16 output slab (half the param/writeback DMA) -----
    fwd_bf16 = jax.jit(functools.partial(
        autoencoder_forward, state_dim=STATE_DIM, action_dim=ACTION_DIM,
        hidden_dim=HIDDEN_DIM, out_dtype=jnp.bfloat16))
    packed_bf16 = pack_params(params, STATE_DIM, ACTION_DIM, HIDDEN_DIM,
                              dtype=jnp.bfloat16)
    ns_b, r_b, ra_b, lat_b = fwd_bf16(states, actions, packed_bf16, bias_f32)
    jax.block_until_ready((ns_b, r_b, ra_b, lat_b))
    assert bool(jnp.all(jnp.isfinite(ns_b.astype(jnp.float32))))
    assert bool(jnp.all(jnp.isfinite(lat_b.astype(jnp.float32))))
    assert float(jnp.max(jnp.abs(lat_b.astype(jnp.float32) - lat_ref))) < 0.3
    assert float(jnp.max(jnp.abs(ns_b.astype(jnp.float32) - ns_ref))) < 0.3

    # TODO(synk): single_buffer_params=True (pl.Buffered(1) on the resident
    # weight slab) is exposed for v7x large-H configs but not exercised here.

    print("KERNEL_OK")
</pallas_src>

<mosaic_0001>
module attributes {stable_mosaic.version = 11 : i64} {
  func.func @kernel(%arg0: i32, %arg1: memref<8x16xf32, #tpu.memory_space<vmem>>, %arg2: memref<8x8xf32, #tpu.memory_space<vmem>>, %arg3: memref<416x128xf32, #tpu.memory_space<vmem>>, %arg4: memref<8x128xf32, #tpu.memory_space<vmem>>, %arg5: memref<8x128xf32, #tpu.memory_space<vmem>>) attributes {dimension_semantics = [#tpu.dimension_semantics<parallel>], iteration_bounds = array<i64: 1>, scalar_prefetch = 0 : i64, scratch_operands = 0 : i64, tpu.core_type = #tpu.core_type<tc>, window_params = [{transform_indices = @transform_0, window_bounds = array<i64: 8, 16>}, {transform_indices = @transform_1, window_bounds = array<i64: 8, 8>}, {pipeline_mode = #tpu.pipeline_mode<synchronous>, transform_indices = @transform_2, window_bounds = array<i64: 416, 128>}, {pipeline_mode = #tpu.pipeline_mode<synchronous>, transform_indices = @transform_3, window_bounds = array<i64: 8, 128>}, {transform_indices = @transform_4, window_bounds = array<i64: 8, 128>}]} {
    %c0 = arith.constant 0 : index
    %c0_0 = arith.constant 0 : index
    %0 = vector.load %arg1[%c0, %c0_0] : memref<8x16xf32, #tpu.memory_space<vmem>>, vector<8x16xf32>
    %c0_1 = arith.constant 0 : index
    %c0_2 = arith.constant 0 : index
    %1 = vector.load %arg2[%c0_1, %c0_2] : memref<8x8xf32, #tpu.memory_space<vmem>>, vector<8x8xf32>
    %c0_3 = arith.constant 0 : index
    %c0_4 = arith.constant 0 : index
    %2 = vector.load %arg3[%c0_3, %c0_4] : memref<416x128xf32, #tpu.memory_space<vmem>>, vector<16x128xf32>
    %c16 = arith.constant 16 : index
    %c0_5 = arith.constant 0 : index
    %3 = vector.load %arg3[%c16, %c0_5] : memref<416x128xf32, #tpu.memory_space<vmem>>, vector<8x128xf32>
    %c32 = arith.constant 32 : index
    %c0_6 = arith.constant 0 : index
    %4 = vector.load %arg3[%c32, %c0_6] : memref<416x128xf32, #tpu.memory_space<vmem>>, vector<128x128xf32>
    %c160 = arith.constant 160 : index
    %c0_7 = arith.constant 0 : index
    %5 = vector.load %arg3[%c160, %c0_7] : memref<416x128xf32, #tpu.memory_space<vmem>>, vector<128x128xf32>
    %c288 = arith.constant 288 : index
    %c0_8 = arith.constant 0 : index
    %6 = vector.load %arg3[%c288, %c0_8] : memref<416x128xf32, #tpu.memory_space<vmem>>, vector<128x128xf32>
    %c0_9 = arith.constant 0 : index
    %c0_10 = arith.constant 0 : index
    %7 = vector.load %arg4[%c0_9, %c0_10] : memref<8x128xf32, #tpu.memory_space<vmem>>, vector<1x128xf32>
    %c1 = arith.constant 1 : index
    %c0_11 = arith.constant 0 : index
    %8 = vector.load %arg4[%c1, %c0_11] : memref<8x128xf32, #tpu.memory_space<vmem>>, vector<1x128xf32>
    %c2 = arith.constant 2 : index
    %c0_12 = arith.constant 0 : index
    %9 = vector.load %arg4[%c2, %c0_12] : memref<8x128xf32, #tpu.memory_space<vmem>>, vector<1x128xf32>
    %c3 = arith.constant 3 : index
    %c0_13 = arith.constant 0 : index
    %10 = vector.load %arg4[%c3, %c0_13] : memref<8x128xf32, #tpu.memory_space<vmem>>, vector<1x128xf32>
    %cst = arith.constant dense<0.000000e+00> : vector<8x128xf32>
    %11 = tpu.matmul %0, %2, %cst {dimension_numbers = #tpu.dot_dimension_numbers<[1], [0], [0], [1], [0, 0, 1, 1], [], []>} : vector<8x16xf32>, vector<16x128xf32>, vector<8x128xf32> -> vector<8x128xf32>
    %cst_14 = arith.constant dense<0.000000e+00> : vector<8x128xf32>
    %12 = tpu.matmul %1, %3, %cst_14 {dimension_numbers = #tpu.dot_dimension_numbers<[1], [0], [0], [1], [0, 0, 1, 1], [], []>} : vector<8x8xf32>, vector<8x128xf32>, vector<8x128xf32> -> vector<8x128xf32>
    %13 = arith.addf %11, %12 : vector<8x128xf32>
    %14 = vector.broadcast %7 : vector<1x128xf32> to vector<8x128xf32>
    %15 = arith.addf %13, %14 : vector<8x128xf32>
    %cst_15 = arith.constant 0.000000e+00 : f32
    %16 = vector.broadcast %cst_15 : f32 to vector<8x128xf32>
    %17 = arith.maximumf %15, %16 : vector<8x128xf32>
    %cst_16 = arith.constant dense<0.000000e+00> : vector<8x128xf32>
    %18 = tpu.matmul %17, %4, %cst_16 {dimension_numbers = #tpu.dot_dimension_numbers<[1], [0], [0], [1], [0, 0, 1, 1], [], []>} : vector<8x128xf32>, vector<128x128xf32>, vector<8x128xf32> -> vector<8x128xf32>
    %19 = vector.broadcast %8 : vector<1x128xf32> to vector<8x128xf32>
    %20 = arith.addf %18, %19 : vector<8x128xf32>
    %cst_17 = arith.constant 0.000000e+00 : f32
    %21 = vector.broadcast %cst_17 : f32 to vector<8x128xf32>
    %22 = arith.maximumf %20, %21 : vector<8x128xf32>
    %cst_18 = arith.constant dense<0.000000e+00> : vector<8x128xf32>
    %23 = tpu.matmul %22, %5, %cst_18 {dimension_numbers = #tpu.dot_dimension_numbers<[1], [0], [0], [1], [0, 0, 1, 1], [], []>} : vector<8x128xf32>, vector<128x128xf32>, vector<8x128xf32> -> vector<8x128xf32>
    %24 = vector.broadcast %9 : vector<1x128xf32> to vector<8x128xf32>
    %25 = arith.addf %23, %24 : vector<8x128xf32>
    %cst_19 = arith.constant 0.000000e+00 : f32
    %26 = vector.broadcast %cst_19 : f32 to vector<8x128xf32>
    %27 = arith.maximumf %25, %26 : vector<8x128xf32>
    %cst_20 = arith.constant dense<0.000000e+00> : vector<8x128xf32>
    %28 = tpu.matmul %27, %6, %cst_20 {dimension_numbers = #tpu.dot_dimension_numbers<[1], [0], [0], [1], [0, 0, 1, 1], [], []>} : vector<8x128xf32>, vector<128x128xf32>, vector<8x128xf32> -> vector<8x128xf32>
    %29 = vector.broadcast %10 : vector<1x128xf32> to vector<8x128xf32>
    %30 = arith.addf %28, %29 : vector<8x128xf32>
    %c0_21 = arith.constant 0 : index
    %c0_22 = arith.constant 0 : index
    %31 = vector.load %arg5[%c0_21, %c0_22] : memref<8x128xf32, #tpu.memory_space<vmem>>, vector<8x128xf32>
    tpu.vector_store %arg5[%c0_21, %c0_22], %30 {strides = array<i32>} : memref<8x128xf32, #tpu.memory_space<vmem>>, vector<8x128xf32>,
    return
  }
  func.func @transform_0(%arg0: i32) -> (i32, i32) {
    %c0_i32 = arith.constant 0 : i32
    %c0_i32_0 = arith.constant 0 : i32
    return %arg0, %c0_i32 : i32, i32
  }
  func.func @transform_1(%arg0: i32) -> (i32, i32) {
    %c0_i32 = arith.constant 0 : i32
    %c0_i32_0 = arith.constant 0 : i32
    return %arg0, %c0_i32 : i32, i32
  }
  func.func @transform_2(%arg0: i32) -> (i32, i32) {
    %c0_i32 = arith.constant 0 : i32
    %c0_i32_0 = arith.constant 0 : i32
    %c0_i32_1 = arith.constant 0 : i32
    return %c0_i32, %c0_i32_0 : i32, i32
  }
  func.func @transform_3(%arg0: i32) -> (i32, i32) {
    %c0_i32 = arith.constant 0 : i32
    %c0_i32_0 = arith.constant 0 : i32
    %c0_i32_1 = arith.constant 0 : i32
    return %c0_i32, %c0_i32_0 : i32, i32
  }
  func.func @transform_4(%arg0: i32) -> (i32, i32) {
    %c0_i32 = arith.constant 0 : i32
    %c0_i32_0 = arith.constant 0 : i32
    return %arg0, %c0_i32 : i32, i32
  }
}

</mosaic_0001>

<bundles_post_ra>
// kernel: autoencoder_forward.1
= control target key start
LH: loop header
LB: loop body
LE: loop exit
PB: predicated region body
PF: predicated region fallthrough
CT: control target
= control target key end

     0   :  { %9 = vsyncpa [#allocation3], 0  ;;  %s891_s0 = inlined_call_operand.hbm [shape: f32[8,16], index: 0, kind: input, shape index: {}]   ;;  %s892_s1 = inlined_call_operand.hbm [shape: f32[8,8], index: 1, kind: input, shape index: {}]   ;;  %s893_s2 = inlined_call_operand.hbm [shape: f32[416,128], index: 2, kind: input, shape index: {}]   ;;  %s894_s3 = inlined_call_operand.hbm [shape: f32[8,128], index: 3, kind: input, shape index: {}]   ;;  %s895_s4 = inlined_call_operand.vmem [shape: f32[8,128], index: 4, kind: output, shape index: {}]  }
   0x1   :  { %10 = vsyncpa [#allocation5], 0 }
   0x2   :  { %11 = vsyncpa [#allocation8], 0  ;;  %s782_s15 = smov [#allocation4]   ;;  %s783_s17 = smov [#allocation2]  }
   0x3   :  { %s28_s16 = sshll.u32 %s782_s15, 4  ;;  %s18_s18 = sshll.u32 %s783_s17, 4  ;;  %s29_s16 = int_to_ptr.vmem [resolvable:$true] %s28_s16  ;;  %s19_s18 = int_to_ptr.vmem [resolvable:$true] %s18_s18 }
   0x4   :  { %s704_s19 = scalar_lea.vmem %s29_s16, 128  ;;  %p709_p1 = scmp.lt.s32.totalorder %s29_s16, %s29_s16 }
   0x5   :  { %p705_p0 = scmp.ne.s32.totalorder %s29_s16, %s704_s19  ;;  %p710_p2 = scmp.lt.s32.totalorder %s704_s19, %s704_s19 }
   0x7   :  { %p711_p3 = por %p710_p2, %p709_p1 }
   0x9   :  { %p712_p4 = pnand %p711_p3, %p705_p0 }
   0xb   :  { %715 = shalt.err (!%p712_p4)
}
   0xc   :  { %31 = dma.hbm_to_vmem [thread:$0]  %s892_s1, 128, %s29_s16, [#allocation5]  }
   0xd   :  { %s724_s22 = scalar_lea.vmem %s19_s18, 128  ;;  %p729_p6 = scmp.lt.s32.totalorder %s19_s18, %s19_s18 }
   0xe   :  { %p725_p5 = scmp.ne.s32.totalorder %s19_s18, %s724_s22  ;;  %p730_p7 = scmp.lt.s32.totalorder %s724_s22, %s724_s22 }
  0x10   :  { %p731_p8 = por %p730_p7, %p729_p6 }
  0x12   :  { %p732_p9 = pnand %p731_p8, %p725_p5 }
  0x14   :  { %735 = shalt.err (!%p732_p9)
}
  0x15   :  { %21 = dma.hbm_to_vmem [thread:$0]  %s891_s0, 128, %s19_s18, [#allocation3]  }
  0x16   :  { %s784_s25 = smov [#allocation6]  }
  0x17   :  { %s37_s26 = sshll.u32 %s784_s25, 4  ;;  %s38_s26 = int_to_ptr.vmem [resolvable:$true] %s37_s26 }
  0x18   :  { %s744_s27 = scalar_lea.vmem %s38_s26, 6656  ;;  %p749_p11 = scmp.lt.s32.totalorder %s38_s26, %s38_s26 }
  0x19   :  { %p745_p10 = scmp.ne.s32.totalorder %s38_s26, %s744_s27  ;;  %p750_p12 = scmp.lt.s32.totalorder %s744_s27, %s744_s27 }
  0x1b   :  { %p751_p13 = por %p750_p12, %p749_p11 }
  0x1d   :  { %p752_p0 = pnand %p751_p13, %p745_p10 }
  0x1f   :  { %755 = shalt.err (!%p752_p0)
}
  0x20   :  { %s785_s1 = smov 128   ;;  %s786_s28 = smov 8  }
  0x21   :  { %43 = dma.hbm_to_vmem [thread:$0]  %s893_s2, 6656, %s38_s26, [#allocation5], %s785_s1, %s785_s1, %s786_s28  }
  0x22   :  { %s787_s5 = smov [#allocation7]  }
  0x23   :  { %s50_s6 = sshll.u32 %s787_s5, 4  ;;  %s51_s6 = int_to_ptr.vmem [resolvable:$true] %s50_s6 }
  0x24   :  { %s764_s0 = scalar_lea.vmem %s51_s6, 128  ;;  %p769_p2 = scmp.lt.s32.totalorder %s51_s6, %s51_s6 }
  0x25   :  { %p765_p1 = scmp.ne.s32.totalorder %s51_s6, %s764_s0  ;;  %p770_p3 = scmp.lt.s32.totalorder %s764_s0, %s764_s0 }
  0x27   :  { %p771_p4 = por %p770_p3, %p769_p2 }
  0x29   :  { %p772_p5 = pnand %p771_p4, %p765_p1 }
  0x2b   :  { %775 = shalt.err (!%p772_p5)
}
  0x2c   :  { %53 = dma.hbm_to_vmem [thread:$0]  %s894_s3, 128, %s51_s6, [#allocation8]  }
  0x2d   :  { %776 = dma.done.wait [#allocation3], 128  }
  0x2e   :  { %777 = vsyncadd [#allocation3], 4294967168 }
  0x2f   :  { %778 = dma.done.wait [#allocation5], 6784  }
  0x30   :  { %779 = vsyncadd [#allocation5], 4294960512 }
  0x31   :  { %780 = dma.done.wait [#allocation8], 128  }
  0x32   :  { %781 = vsyncadd [#allocation8], 4294967168  ;;  %v788_v0 = vmov 0.0   ;;  %vm789_vm0 = vmmov 0   ;;  %vm123_vm1 = vcmask 64512   ;;  %v70_v1 = vld [vmem:[#allocation6 + $0x10] sm:$0xff] }
  0x33   :  { %571 = vmatprep.subr.mxu1 %v788_v0  ;;  %573 = vmatprep.mubr.msk.f32.mxu1 %vm789_vm0, %v788_v0  ;;  %v67_v2 = vld [vmem:[#allocation4] sm:$0xff]  ;;  %v69_v3 = vld [vmem:[#allocation6 + $0x8] sm:$0xff]  ;;  %v68_v5 = vld [vmem:[#allocation6] sm:$0xff]  ;;  %vm197_vm2 = vcmask 130048  }
  0x34   :  { %583 = vmatprep.subr.mxu0 %v788_v0  ;;  %615 = vmatprep.mubr.msk.f32.mxu0 %vm789_vm0, %v788_v0  ;;  %v86_v4 = vld [vmem:[#allocation6 + $0x98] sm:$0xff]  ;;  %v66_v6 = vld [vmem:[#allocation2] sm:$0xff]  ;;  %v84_v8 = vld [vmem:[#allocation6 + $0x88] sm:$0xff] }
  0x35   :  { %572 = vmatpush3.msra.mxu1 %v70_v1  ;;  %v85_v7 = vld [vmem:[#allocation6 + $0x90] sm:$0xff]  ;;  %584 = vmatpush3.msra.mxu0 %v86_v4  ;;  %v83_v9 = vld [vmem:[#allocation6 + $0x80] sm:$0xff]  ;;  %v82_v10 = vld [vmem:[#allocation6 + $0x78] sm:$0xff] }
  0x36   :  { %574 = vmatmul.mubr.msk.f32.vlgmr.msra.gmra.mxu1 %vm123_vm1, %v67_v2  ;;  %576 = vmatprep.subr.mxu1 %v788_v0  ;;  %v81_v11 = vld [vmem:[#allocation6 + $0x70] sm:$0xff]  ;;  %v80_v12 = vld [vmem:[#allocation6 + $0x68] sm:$0xff]  ;;  %v79_v13 = vld [vmem:[#allocation6 + $0x60] sm:$0xff] }
  0x37   :  { %577 = vmatpush3.msra.mxu1 %v69_v3  ;;  %580 = vmatprep.mubr.msk.f32.mxu1 %vm789_vm0, %v788_v0  ;;  %v78_v14 = vld [vmem:[#allocation6 + $0x58] sm:$0xff]  ;;  %v77_v15 = vld [vmem:[#allocation6 + $0x50] sm:$0xff]  ;;  %v76_v16 = vld [vmem:[#allocation6 + $0x48] sm:$0xff] }
  0x38   :  { %578 = vmatprep.subr.mxu1 %v788_v0  ;;  %585 = vmatprep.subr.mxu0 %v788_v0  ;;  %v75_v17 = vld [vmem:[#allocation6 + $0x40] sm:$0xff]  ;;  %v74_v18 = vld [vmem:[#allocation6 + $0x38] sm:$0xff]  ;;  %v73_v19 = vld [vmem:[#allocation6 + $0x30] sm:$0xff] }
  0x39   :  { %579 = vmatpush3.msra.mxu1 %v68_v5  ;;  %586 = vmatpush3.msra.mxu0 %v85_v7  ;;  %v72_v20 = vld [vmem:[#allocation6 + $0x28] sm:$0xff]  ;;  %v71_v21 = vld [vmem:[#allocation6 + $0x20] sm:$0xff]  ;;  %v102_v22 = vld [vmem:[#allocation6 + $0x118] sm:$0xff] }
  0x3a   :  { %581 = vmatmul.mubr.msk.f32.vlgmr.msra.gmra.mxu1 %vm197_vm2, %v66_v6  ;;  %587 = vmatprep.subr.mxu0 %v788_v0  ;;  %v101_v23 = vld [vmem:[#allocation6 + $0x110] sm:$0xff]  ;;  %v100_v24 = vld [vmem:[#allocation6 + $0x108] sm:$0xff]  ;;  %v99_v25 = vld [vmem:[#allocation6 + $0x100] sm:$0xff] }
  0x3b   :  { %618 = vmatprep.subr.mxu1 %v788_v0  ;;  %588 = vmatpush3.msra.mxu0 %v84_v8  ;;  %v98_v26 = vld [vmem:[#allocation6 + $0xf8] sm:$0xff]  ;;  %v97_v27 = vld [vmem:[#allocation6 + $0xf0] sm:$0xff]  ;;  %v96_v28 = vld [vmem:[#allocation6 + $0xe8] sm:$0xff] }
  0x3c   :  { %650 = vmatprep.mubr.msk.f32.mxu1 %vm789_vm0, %v788_v0  ;;  %589 = vmatprep.subr.mxu0 %v788_v0  ;;  %v95_v29 = vld [vmem:[#allocation6 + $0xe0] sm:$0xff]  ;;  %v94_v30 = vld [vmem:[#allocation6 + $0xd8] sm:$0xff]  ;;  %v93_v31 = vld [vmem:[#allocation6 + $0xd0] sm:$0xff] }
  0x3d   :  { %590 = vmatpush3.msra.mxu0 %v83_v9  ;;  %619 = vmatpush3.msra.mxu1 %v102_v22  ;;  %v92_v32 = vld [vmem:[#allocation6 + $0xc8] sm:$0xff]  ;;  %v91_v33 = vld [vmem:[#allocation6 + $0xc0] sm:$0xff]  ;;  %v90_v34 = vld [vmem:[#allocation6 + $0xb8] sm:$0xff] }
  0x3e   :  { %591 = vmatprep.subr.mxu0 %v788_v0  ;;  %620 = vmatprep.subr.mxu1 %v788_v0  ;;  %v511_v37 = vld [vmem:[#allocation7] ss:$0 sm:$0xff]  ;;  %v89_v43 = vld [vmem:[#allocation6 + $0xb0] sm:$0xff]  ;;  %v88_v44 = vld [vmem:[#allocation6 + $0xa8] sm:$0xff] }
  0x3f   :  { %592 = vmatpush3.msra.mxu0 %v82_v10  ;;  %621 = vmatpush3.msra.mxu1 %v101_v23  ;;  %v87_v45 = vld [vmem:[#allocation6 + $0xa0] sm:$0xff]  ;;  %v118_v46 = vld [vmem:[#allocation6 + $0x198] sm:$0xff]  ;;  %v117_v47 = vld [vmem:[#allocation6 + $0x190] sm:$0xff] }
  0x40   :  { %593 = vmatprep.subr.mxu0 %v788_v0  ;;  %622 = vmatprep.subr.mxu1 %v788_v0  ;;  %v116_v48 = vld [vmem:[#allocation6 + $0x188] sm:$0xff]  ;;  %v115_v49 = vld [vmem:[#allocation6 + $0x180] sm:$0xff]  ;;  %v114_v50 = vld [vmem:[#allocation6 + $0x178] sm:$0xff] }
  0x41   :  { %594 = vmatpush3.msra.mxu0 %v81_v11  ;;  %623 = vmatpush3.msra.mxu1 %v100_v24  ;;  %v113_v51 = vld [vmem:[#allocation6 + $0x170] sm:$0xff]  ;;  %v112_v52 = vld [vmem:[#allocation6 + $0x168] sm:$0xff]  ;;  %v111_v53 = vld [vmem:[#allocation6 + $0x160] sm:$0xff] }
  0x42   :  { %595 = vmatprep.subr.mxu0 %v788_v0  ;;  %624 = vmatprep.subr.mxu1 %v788_v0  ;;  %v110_v54 = vld [vmem:[#allocation6 + $0x158] sm:$0xff]  ;;  %v109_v55 = vld [vmem:[#allocation6 + $0x150] sm:$0xff]  ;;  %v108_v56 = vld [vmem:[#allocation6 + $0x148] sm:$0xff] }
  0x43   :  { %596 = vmatpush3.msra.mxu0 %v80_v12  ;;  %625 = vmatpush3.msra.mxu1 %v99_v25  ;;  %v107_v57 = vld [vmem:[#allocation6 + $0x140] sm:$0xff]  ;;  %v106_v58 = vld [vmem:[#allocation6 + $0x138] sm:$0xff]  ;;  %v105_v1 = vld [vmem:[#allocation6 + $0x130] sm:$0xff] }
  0x44   :  { %597 = vmatprep.subr.mxu0 %v788_v0  ;;  %626 = vmatprep.subr.mxu1 %v788_v0  ;;  %v512_v59 = vld [vmem:[#allocation7 + $0x1] ss:$0 sm:$0xff]  ;;  %v104_v2 = vld [vmem:[#allocation6 + $0x128] sm:$0xff]  ;;  %v513_v4 = vld [vmem:[#allocation7 + $0x2] ss:$0 sm:$0xff] }
  0x45   :  { %598 = vmatpush3.msra.mxu0 %v79_v13  ;;  %627 = vmatpush3.msra.mxu1 %v98_v26  ;;  %v103_v3 = vld [vmem:[#allocation6 + $0x120] sm:$0xff] }
  0x46   :  { %599 = vmatprep.subr.mxu0 %v788_v0  ;;  %628 = vmatprep.subr.mxu1 %v788_v0  ;;  %v514_v9 = vld [vmem:[#allocation7 + $0x3] ss:$0 sm:$0xff] }
  0x47   :  { %600 = vmatpush3.msra.mxu0 %v78_v14  ;;  %629 = vmatpush3.msra.mxu1 %v97_v27 }
  0x48   :  { %601 = vmatprep.subr.mxu0 %v788_v0  ;;  %630 = vmatprep.subr.mxu1 %v788_v0 }
  0x49   :  { %602 = vmatpush3.msra.mxu0 %v77_v15  ;;  %631 = vmatpush3.msra.mxu1 %v96_v28 }
  0x4a   :  { %603 = vmatprep.subr.mxu0 %v788_v0  ;;  %632 = vmatprep.subr.mxu1 %v788_v0 }
  0x4b   :  { %604 = vmatpush3.msra.mxu0 %v76_v16  ;;  %633 = vmatpush3.msra.mxu1 %v95_v29 }
  0x4c   :  { %605 = vmatprep.subr.mxu0 %v788_v0  ;;  %634 = vmatprep.subr.mxu1 %v788_v0 }
  0x4d   :  { %606 = vmatpush3.msra.mxu0 %v75_v17  ;;  %635 = vmatpush3.msra.mxu1 %v94_v30 }
  0x4e   :  { %607 = vmatprep.subr.mxu0 %v788_v0  ;;  %636 = vmatprep.subr.mxu1 %v788_v0 }
  0x4f   :  { %608 = vmatpush3.msra.mxu0 %v74_v18  ;;  %637 = vmatpush3.msra.mxu1 %v93_v31 }
  0x50   :  { %609 = vmatprep.subr.mxu0 %v788_v0  ;;  %638 = vmatprep.subr.mxu1 %v788_v0 }
  0x51   :  { %610 = vmatpush3.msra.mxu0 %v73_v19  ;;  %639 = vmatpush3.msra.mxu1 %v92_v32 }
  0x52   :  { %611 = vmatprep.subr.mxu0 %v788_v0  ;;  %640 = vmatprep.subr.mxu1 %v788_v0 }
  0x53   :  { %612 = vmatpush3.msra.mxu0 %v72_v20  ;;  %641 = vmatpush3.msra.mxu1 %v91_v33 }
  0x54   :  { %613 = vmatprep.subr.mxu0 %v788_v0  ;;  %642 = vmatprep.subr.mxu1 %v788_v0 }
  0x55   :  { %614 = vmatpush3.msra.mxu0 %v71_v21  ;;  %643 = vmatpush3.msra.mxu1 %v90_v34 }
  0x56   :  { %653 = vmatprep.subr.mxu0 %v788_v0  ;;  %644 = vmatprep.subr.mxu1 %v788_v0 }
  0x57   :  { %645 = vmatpush3.msra.mxu1 %v89_v43 }
  0x58   :  { %646 = vmatprep.subr.mxu1 %v788_v0 }
  0x59   :  { %647 = vmatpush3.msra.mxu1 %v88_v44 }
  0x5a   :  { %648 = vmatprep.subr.mxu1 %v788_v0 }
  0x5b   :  { %649 = vmatpush3.msra.mxu1 %v87_v45 }
  0xf6   :  { %v193_v35 = vpop.f32.mrf.mxu1 }
  0xf8   :  { %v575_v36 = vpop.f32.mrf.mxu1 }
  0xfa   :  { %v267_v38 = vpop.f32.mrf.mxu1 }
  0xfb   :  { %v268_v39 = vadd.f32 %v267_v38, %v193_v35 }
  0xfc   :  { %v582_v40 = vpop.f32.mrf.mxu1 }
  0xfd   :  { %v275_v41 = vadd.f32 %v511_v37, %v268_v39 }
  0xff   :  { %v276_v42 = vmax.f32 %v275_v41, 0.0 }
 0x101   :  { %616 = vmatmul.mubr.f32.vlgmr.msra.gmra.mxu0 %v276_v42 }
 0x102   :  { %685 = vmatprep.mubr.msk.f32.mxu0 %vm789_vm0, %v788_v0  ;;  %654 = vmatpush3.msra.mxu0 %v118_v46 }
 0x103   :  { %655 = vmatprep.subr.mxu0 %v788_v0 }
 0x104   :  { %656 = vmatpush3.msra.mxu0 %v117_v47 }
 0x105   :  { %657 = vmatprep.subr.mxu0 %v788_v0 }
 0x106   :  { %658 = vmatpush3.msra.mxu0 %v116_v48 }
 0x107   :  { %659 = vmatprep.subr.mxu0 %v788_v0 }
 0x108   :  { %660 = vmatpush3.msra.mxu0 %v115_v49 }
 0x109   :  { %661 = vmatprep.subr.mxu0 %v788_v0 }
 0x10a   :  { %662 = vmatpush3.msra.mxu0 %v114_v50 }
 0x10b   :  { %663 = vmatprep.subr.mxu0 %v788_v0 }
 0x10c   :  { %664 = vmatpush3.msra.mxu0 %v113_v51 }
 0x10d   :  { %665 = vmatprep.subr.mxu0 %v788_v0 }
 0x10e   :  { %666 = vmatpush3.msra.mxu0 %v112_v52 }
 0x10f   :  { %667 = vmatprep.subr.mxu0 %v788_v0 }
 0x110   :  { %668 = vmatpush3.msra.mxu0 %v111_v53 }
 0x111   :  { %669 = vmatprep.subr.mxu0 %v788_v0 }
 0x112   :  { %670 = vmatpush3.msra.mxu0 %v110_v54 }
 0x113   :  { %671 = vmatprep.subr.mxu0 %v788_v0 }
 0x114   :  { %672 = vmatpush3.msra.mxu0 %v109_v55 }
 0x115   :  { %673 = vmatprep.subr.mxu0 %v788_v0 }
 0x116   :  { %674 = vmatpush3.msra.mxu0 %v108_v56 }
 0x117   :  { %675 = vmatprep.subr.mxu0 %v788_v0 }
 0x118   :  { %676 = vmatpush3.msra.mxu0 %v107_v57 }
 0x119   :  { %677 = vmatprep.subr.mxu0 %v788_v0 }
 0x11a   :  { %678 = vmatpush3.msra.mxu0 %v106_v58 }
 0x11b   :  { %679 = vmatprep.subr.mxu0 %v788_v0 }
 0x11c   :  { %680 = vmatpush3.msra.mxu0 %v105_v1 }
 0x11d   :  { %681 = vmatprep.subr.mxu0 %v788_v0 }
 0x11e   :  { %682 = vmatpush3.msra.mxu0 %v104_v2 }
 0x11f   :  { %683 = vmatprep.subr.mxu0 %v788_v0 }
 0x120   :  { %684 = vmatpush3.msra.mxu0 %v103_v3 }
 0x1c1   :  { %v347_v60 = vpop.f32.mrf.mxu0 }
 0x1c2   :  { %v348_v61 = vadd.f32 %v512_v59, %v347_v60 }
 0x1c3   :  { %v617_v62 = vpop.f32.mrf.mxu0 }
 0x1c4   :  { %v351_v63 = vmax.f32 %v348_v61, 0.0 }
 0x1c6   :  { %651 = vmatmul.mubr.f32.vlgmr.msra.gmra.mxu1 %v351_v63 }
 0x286   :  { %v422_v5 = vpop.f32.mrf.mxu1 }
 0x287   :  { %v423_v6 = vadd.f32 %v513_v4, %v422_v5 }
 0x288   :  { %v652_v7 = vpop.f32.mrf.mxu1 }
 0x289   :  { %v426_v8 = vmax.f32 %v423_v6, 0.0 }
 0x28b   :  { %686 = vmatmul.mubr.f32.vlgmr.msra.gmra.mxu0 %v426_v8 }
 0x34b   :  { %v497_v10 = vpop.f32.mrf.mxu0 }
 0x34c   :  { %v498_v11 = vadd.f32 %v514_v9, %v497_v10 }
 0x34d   :  { %v687_v12 = vpop.f32.mrf.mxu0 }
 0x34e   :  { %501 = vst [vmem:[%s895_s4] sm:$0xff] %v498_v11 }
 0x34f   :  { %506 = vsyncpa [#allocation3], 1 }
 0x350   :  { %507 = vsyncpa [#allocation5], 1 }
 0x351   :  { %508 = vsyncpa [#allocation8], 1 }

</bundles_post_ra>
